<compile_context>
chip_gen: v6e
topology: v6e:2x2x1
jax: 0.10.0
libtpu: 0.0.40
codegen_flags: <defaults>
</compile_context>

<pallas_src>
import functools

import jax
import jax.numpy as jnp
from jax import lax
from jax.experimental import pallas as pl
from jax.experimental.pallas import tpu as pltpu


def _transform_kernel(x_ref, wt_ref, p_ref, o_ref, *, eps, approximate_gelu):
    # x_ref:  (tm, H) activations (native dtype)
    # wt_ref: (H_in, H_out) pre-transposed weight (W^T), resident in VMEM
    # p_ref:  (3, H) fused params: row 0 = bias, row 1 = gamma, row 2 = beta
    # o_ref:  (tm, H)

    # Dense: h = x @ W^T.  wt_ref already holds W^T, so the MXU sees a native
    # (M,K)@(K,N) contraction with native-dtype operands and an f32 accumulator;
    # no per-tile XLU transpose of the HxH weight.
    h = jnp.dot(x_ref[...], wt_ref[...], preferred_element_type=jnp.float32)
    h = h + p_ref[0:1, :].astype(jnp.float32)

    if approximate_gelu:
        # tanh-approx GELU: tanh lowers to the EUP (an otherwise-idle VLIW
        # slot), so the activation is nearly free.  ~1e-3 off torch's exact
        # erf GELU.
        c = jnp.float32(0.7978845608028654)  # sqrt(2/pi)
        h = 0.5 * h * (1.0 + jnp.tanh(c * (h + jnp.float32(0.044715) * h * h * h)))
    else:
        # Exact erf GELU, bit-matching torch.nn.GELU() default numerics.
        # (VPU polynomial; set approximate_gelu=True on v5e/v6e if the VALU
        # slot saturates and exact parity is not required.)
        h = 0.5 * h * (1.0 + lax.erf(h * jnp.float32(0.7071067811865476)))

    # LayerNorm over the hidden axis: two-pass centered variance (biased, as
    # torch) - avoids the single-pass E[h^2]-mean^2 cancellation.
    inv_h = jnp.float32(1.0 / h.shape[-1])
    mean = jnp.sum(h, axis=-1, keepdims=True) * inv_h
    centered = h - mean
    var = jnp.sum(centered * centered, axis=-1, keepdims=True) * inv_h
    inv_std = lax.rsqrt(var + jnp.float32(eps))
    out = centered * inv_std * p_ref[1:2, :].astype(jnp.float32) \
        + p_ref[2:3, :].astype(jnp.float32)

    o_ref[...] = out.astype(o_ref.dtype)


def _round_up(n, m):
    return ((n + m - 1) // m) * m


def bert_prediction_head_transform(x, weight, bias, gamma, beta, *, eps=1e-12,
                                   tm=512, approximate_gelu=False,
                                   stream_buffers=2):
    """x: [B, S, H]; weight: [H, H] (PyTorch [out, in]); bias/gamma/beta: [H]."""
    B, S, H = x.shape
    M = B * S

    x2d = x.reshape(M, H)

    # Only pad when M is not a multiple of 8 (rare for BERT batch*seq).  The
    # generic partial last tile is handled by the cdiv grid + masked writeback,
    # so no full-array pad / slice HBM round trips in the common case.
    m_eff = _round_up(M, 8)
    if m_eff != M:
        x2d = jnp.pad(x2d, ((0, m_eff - M), (0, 0)))

    # Row tile: at most `tm`, but never so large that the grid collapses to a
    # single step when it could have >= 2 (v7x shards the parallel row axis
    # across its two TensorCores; a 1-step grid idles one of them).
    half = _round_up(pl.cdiv(m_eff, 2), 8)
    tm_eff = max(8, min(_round_up(tm, 8), half))
    grid = pl.cdiv(m_eff, tm_eff)

    # One-time ops on static parameters (outside the kernel, fused by XLA):
    w_t = weight.T                                  # [in, out] for (M,K)@(K,N)
    params = jnp.stack([bias, gamma, beta], axis=0)  # (3, H) fused residents

    kernel = functools.partial(_transform_kernel, eps=eps,
                               approximate_gelu=approximate_gelu)

    # VMEM budget: streamed x (stream_buffers) + out (2 buffers), resident
    # single-buffered W^T + fused params, 25% + 2 MiB headroom.  Cap at 48 MiB
    # so v7x's 64 MiB/TC still has room for compiler-internal scratch.
    act_bytes = jnp.dtype(x.dtype).itemsize
    par_bytes = jnp.dtype(weight.dtype).itemsize
    vmem_need = ((stream_buffers + 2) * tm_eff * H * act_bytes
                 + (H * H + 3 * H) * par_bytes)
    vmem_limit = min(max(int(1.25 * vmem_need) + (2 << 20), 16 << 20), 48 << 20)

    resident = dict(pipeline_mode=pl.Buffered(1))   # constant-index operands
    x_kwargs = {} if stream_buffers == 2 else dict(
        pipeline_mode=pl.Buffered(stream_buffers))  # e.g. 3 if DMA is exposed

    out2d = pl.pallas_call(
        kernel,
        out_shape=jax.ShapeDtypeStruct((m_eff, H), x.dtype),
        grid_spec=pltpu.PrefetchScalarGridSpec(
            num_scalar_prefetch=0,
            grid=(grid,),
            in_specs=[
                pl.BlockSpec((tm_eff, H), lambda i: (i, 0), **x_kwargs),  # rows
                pl.BlockSpec((H, H), lambda i: (0, 0), **resident),       # W^T
                pl.BlockSpec((3, H), lambda i: (0, 0), **resident),       # b/g/b
            ],
            out_specs=pl.BlockSpec((tm_eff, H), lambda i: (i, 0)),
        ),
        compiler_params=pltpu.CompilerParams(
            dimension_semantics=("parallel",),
            vmem_limit_bytes=vmem_limit,
        ),
    )(x2d, w_t, params)

    if m_eff != M:
        out2d = out2d[:M]
    return out2d.reshape(B, S, H)


def _reference(x, weight, bias, gamma, beta, eps=1e-12, approximate=False):
    h = jnp.einsum("bsh,oh->bso", x, weight) + bias
    if approximate:
        c = 0.7978845608028654
        h = 0.5 * h * (1.0 + jnp.tanh(c * (h + 0.044715 * h * h * h)))
    else:
        h = 0.5 * h * (1.0 + lax.erf(h / jnp.sqrt(2.0)))
    mean = jnp.mean(h, axis=-1, keepdims=True)
    var = jnp.mean((h - mean) ** 2, axis=-1, keepdims=True)
    return (h - mean) * lax.rsqrt(var + eps) * gamma + beta


if __name__ == "__main__":
    key = jax.random.PRNGKey(0)
    B, S, H = 2, 8, 128  # batch, seq, hidden_size
    eps = 1e-12

    k_x, k_w, k_b = jax.random.split(key, 3)
    x = jax.random.normal(k_x, (B, S, H), dtype=jnp.float32)

    # Deterministic params (shapes from nn.Linear(H, H) / nn.LayerNorm(H)).
    weight = jax.random.normal(k_w, (H, H), dtype=jnp.float32) * 0.02  # [out, in]
    bias = jax.random.normal(k_b, (H,), dtype=jnp.float32) * 0.02
    gamma = jnp.ones((H,), dtype=jnp.float32)
    beta = jnp.zeros((H,), dtype=jnp.float32)

    # Exact-erf path (torch.nn.GELU() parity).
    out = bert_prediction_head_transform(x, weight, bias, gamma, beta, eps=eps)
    out = jax.block_until_ready(out)
    ref = _reference(x, weight, bias, gamma, beta, eps=eps)
    assert out.shape == (B, S, H)
    assert jnp.allclose(out, ref, atol=1e-4, rtol=1e-4), "mismatch vs reference"

    # EUP (tanh-approx) GELU path.
    out_a = bert_prediction_head_transform(x, weight, bias, gamma, beta, eps=eps,
                                           approximate_gelu=True)
    out_a = jax.block_until_ready(out_a)
    ref_a = _reference(x, weight, bias, gamma, beta, eps=eps, approximate=True)
    assert jnp.allclose(out_a, ref_a, atol=1e-4, rtol=1e-4), \
        "mismatch vs approx reference"

    print("KERNEL_OK")
</pallas_src>

<mosaic_0001>
module attributes {stable_mosaic.version = 11 : i64} {
  func.func @_transform_kernel(%arg0: i32, %arg1: memref<8x128xf32, #tpu.memory_space<vmem>>, %arg2: memref<128x128xf32, #tpu.memory_space<vmem>>, %arg3: memref<3x128xf32, #tpu.memory_space<vmem>>, %arg4: memref<8x128xf32, #tpu.memory_space<vmem>>) attributes {dimension_semantics = [#tpu.dimension_semantics<parallel>], iteration_bounds = array<i64: 2>, scalar_prefetch = 0 : i64, scratch_operands = 0 : i64, tpu.core_type = #tpu.core_type<tc>, window_params = [{transform_indices = @transform_0, window_bounds = array<i64: 8, 128>}, {pipeline_mode = #tpu.pipeline_mode<synchronous>, transform_indices = @transform_1, window_bounds = array<i64: 128, 128>}, {pipeline_mode = #tpu.pipeline_mode<synchronous>, transform_indices = @transform_2, window_bounds = array<i64: 3, 128>}, {transform_indices = @transform_3, window_bounds = array<i64: 8, 128>}]} {
    %c0 = arith.constant 0 : index
    %c0_0 = arith.constant 0 : index
    %0 = vector.load %arg1[%c0, %c0_0] : memref<8x128xf32, #tpu.memory_space<vmem>>, vector<8x128xf32>
    %c0_1 = arith.constant 0 : index
    %c0_2 = arith.constant 0 : index
    %1 = vector.load %arg2[%c0_1, %c0_2] : memref<128x128xf32, #tpu.memory_space<vmem>>, vector<128x128xf32>
    %cst = arith.constant dense<0.000000e+00> : vector<8x128xf32>
    %2 = tpu.matmul %0, %1, %cst {dimension_numbers = #tpu.dot_dimension_numbers<[1], [0], [0], [1], [0, 0, 1, 1], [], []>} : vector<8x128xf32>, vector<128x128xf32>, vector<8x128xf32> -> vector<8x128xf32>
    %c0_3 = arith.constant 0 : index
    %c0_4 = arith.constant 0 : index
    %3 = vector.load %arg3[%c0_3, %c0_4] : memref<3x128xf32, #tpu.memory_space<vmem>>, vector<1x128xf32>
    %4 = vector.broadcast %3 : vector<1x128xf32> to vector<8x128xf32>
    %5 = arith.addf %2, %4 : vector<8x128xf32>
    %cst_5 = arith.constant 5.000000e-01 : f32
    %6 = vector.broadcast %cst_5 : f32 to vector<8x128xf32>
    %7 = arith.mulf %6, %5 : vector<8x128xf32>
    %cst_6 = arith.constant 0.707106769 : f32
    %8 = vector.broadcast %cst_6 : f32 to vector<8x128xf32>
    %9 = arith.mulf %5, %8 : vector<8x128xf32>
    %10 = math.erf %9 : vector<8x128xf32>
    %cst_7 = arith.constant 1.000000e+00 : f32
    %11 = vector.broadcast %cst_7 : f32 to vector<8x128xf32>
    %12 = arith.addf %11, %10 : vector<8x128xf32>
    %13 = arith.mulf %7, %12 : vector<8x128xf32>
    %cst_8 = arith.constant dense<0.000000e+00> : vector<8xf32>
    %14 = vector.multi_reduction <add>, %13, %cst_8 [1] : vector<8x128xf32> to vector<8xf32>
    %15 = vector.shape_cast %14 : vector<8xf32> to vector<8x1xf32>
    %cst_9 = arith.constant 7.812500e-03 : f32
    %16 = vector.broadcast %cst_9 : f32 to vector<8x1xf32>
    %17 = arith.mulf %15, %16 : vector<8x1xf32>
    %18 = vector.broadcast %17 : vector<8x1xf32> to vector<8x128xf32>
    %19 = arith.subf %13, %18 : vector<8x128xf32>
    %20 = arith.mulf %19, %19 : vector<8x128xf32>
    %cst_10 = arith.constant dense<0.000000e+00> : vector<8xf32>
    %21 = vector.multi_reduction <add>, %20, %cst_10 [1] : vector<8x128xf32> to vector<8xf32>
    %22 = vector.shape_cast %21 : vector<8xf32> to vector<8x1xf32>
    %cst_11 = arith.constant 7.812500e-03 : f32
    %23 = vector.broadcast %cst_11 : f32 to vector<8x1xf32>
    %24 = arith.mulf %22, %23 : vector<8x1xf32>
    %cst_12 = arith.constant 9.99999996E-13 : f32
    %25 = vector.broadcast %cst_12 : f32 to vector<8x1xf32>
    %26 = arith.addf %24, %25 : vector<8x1xf32>
    %27 = math.rsqrt %26 : vector<8x1xf32>
    %28 = vector.broadcast %27 : vector<8x1xf32> to vector<8x128xf32>
    %29 = arith.mulf %19, %28 : vector<8x128xf32>
    %c1 = arith.constant 1 : index
    %c0_13 = arith.constant 0 : index
    %30 = vector.load %arg3[%c1, %c0_13] : memref<3x128xf32, #tpu.memory_space<vmem>>, vector<1x128xf32>
    %31 = vector.broadcast %30 : vector<1x128xf32> to vector<8x128xf32>
    %32 = arith.mulf %29, %31 : vector<8x128xf32>
    %c2 = arith.constant 2 : index
    %c0_14 = arith.constant 0 : index
    %33 = vector.load %arg3[%c2, %c0_14] : memref<3x128xf32, #tpu.memory_space<vmem>>, vector<1x128xf32>
    %34 = vector.broadcast %33 : vector<1x128xf32> to vector<8x128xf32>
    %35 = arith.addf %32, %34 : vector<8x128xf32>
    %c0_15 = arith.constant 0 : index
    %c0_16 = arith.constant 0 : index
    %36 = vector.load %arg4[%c0_15, %c0_16] : memref<8x128xf32, #tpu.memory_space<vmem>>, vector<8x128xf32>
    tpu.vector_store %arg4[%c0_15, %c0_16], %35 {strides = array<i32>} : memref<8x128xf32, #tpu.memory_space<vmem>>, vector<8x128xf32>,
    return
  }
  func.func @transform_0(%arg0: i32) -> (i32, i32) {
    %c0_i32 = arith.constant 0 : i32
    %c0_i32_0 = arith.constant 0 : i32
    return %arg0, %c0_i32 : i32, i32
  }
  func.func @transform_1(%arg0: i32) -> (i32, i32) {
    %c0_i32 = arith.constant 0 : i32
    %c0_i32_0 = arith.constant 0 : i32
    %c0_i32_1 = arith.constant 0 : i32
    return %c0_i32, %c0_i32_0 : i32, i32
  }
  func.func @transform_2(%arg0: i32) -> (i32, i32) {
    %c0_i32 = arith.constant 0 : i32
    %c0_i32_0 = arith.constant 0 : i32
    %c0_i32_1 = arith.constant 0 : i32
    return %c0_i32, %c0_i32_0 : i32, i32
  }
  func.func @transform_3(%arg0: i32) -> (i32, i32) {
    %c0_i32 = arith.constant 0 : i32
    %c0_i32_0 = arith.constant 0 : i32
    return %arg0, %c0_i32 : i32, i32
  }
}

</mosaic_0001>

<bundles_post_ra>
// kernel: tpu_custom_call.1
= control target key start
LH: loop header
LB: loop body
LE: loop exit
PB: predicated region body
PF: predicated region fallthrough
CT: control target
= control target key end

     0   :  { %8 = vsyncpa [#allocation3], 0  ;;  %s933_s0 = inlined_call_operand.hbm [shape: f32[16,128], index: 0, kind: input, shape index: {}]   ;;  %s934_s1 = inlined_call_operand.hbm [shape: f32[128,128], index: 1, kind: input, shape index: {}]   ;;  %s935_s2 = inlined_call_operand.hbm [shape: f32[3,128], index: 2, kind: input, shape index: {}]   ;;  %s936_s3 = inlined_call_operand.hbm [shape: f32[16,128], index: 3, kind: output, shape index: {}]  }
   0x1   :  { %10 = vsyncpa [#allocation3 + $0x1], 0 }
   0x2   :  { %11 = vsyncpa [#allocation6], 0 }
   0x3   :  { %12 = vsyncpa [#allocation4], 0 }
   0x4   :  { %14 = vsyncpa [#allocation4 + $0x1], 0  ;;  %s761_s12 = smov 0   ;;  %s763_s13 = smov 0  }
   0x5   :  { %s765_s14 = smov 0   ;;  %s767_s15 = smov 0  }
   0x6 LB: > { %s782_s16 = sadd.s32 4294967295, %s731_s15   ;;  %s437_s17 = sadd.s32 4294967294, %s731_s15   ;;  %s731_s15 = sphi %s767_s15, %s958_s15   ;;  %s727_s14 = sphi %s765_s14, %s957_s14   ;;  %s723_s13 = sphi %s763_s13, %s956_s13   ;;  %s719_s12 = sphi %s761_s12, %s955_s12  }
   0x7   : > { %p40_p0 = scmp.ne.s32.totalorder %s723_s13, %s719_s12  ;;  %p937_p1 = scmp.eq.s32.totalorder %s782_s16, 0 }
   0x8   : > { %p112_p3 = scmp.eq.s32.totalorder %s437_s17, 1  ;;  %p438_p5 = scmp.ge.s32.totalorder %s731_s15, 1 }
   0x9   : > { %p791_p4 = por %p937_p1, %p40_p0  ;;  %p119_p7 = scmp.lt.s32.totalorder %s731_s15, 3 }
   0xa   : > { %p796_p6 = por %p112_p3, %p40_p0  ;;  %s733_s21 = smov [#allocation5]  }
   0xb   : > { %s941_s18 = scalar_select %p791_p4, 1, 0 }
   0xc   : > { %s942_s19 = scalar_select %p796_p6, 1, 0 }
   0xd   : > { %p801_p8 = pnand %p438_p5, %p119_p7  ;;  %s131_s22 = sshll.u32 %s733_s21, 4  ;;  %s132_s22 = int_to_ptr.vmem [resolvable:$true] %s131_s22 }
   0xe   : > { %s734_s24 = smov [#allocation7]   ;;  %s594_s26 = scalar_lea.vmem %s132_s22, 2048 }
   0xf   : > { %s943_s20 = scalar_select %p801_p8, 1, 0 }
  0x10   : > { %p520_p9 = pneg %p801_p8  ;;  %s145_s25 = sshll.u32 %s734_s24, 4  ;;  %s146_s25 = int_to_ptr.vmem [resolvable:$true] %s145_s25 }
  0x11   : > { %p595_p13 = scmp.ne.s32.totalorder %s132_s22, %s594_s26  ;;  %p602_p5 = scmp.lt.s32.totalorder %s132_s22, %s132_s22 }
  0x12   : > { %p810_p11 = pnand %p520_p9, %p937_p1  ;;  %p603_p7 = scmp.lt.s32.totalorder %s594_s26, %s594_s26 }
  0x14   : > { %p585_p12 = pneg %p810_p11  ;;  %p604_p10 = por %p603_p7, %p602_p5 }
  0x16   : > { %p597_p0 = pnand %p595_p13, %p585_p12 }
  0x18   : > { %p598_p3 = pneg %p597_p0 }
  0x1a   : > { %p605_p9 = pnand %p604_p10, %p598_p3 }
  0x1c   : > { %608 = shalt.err (!%p605_p9)
}
  0x1d   : > { %s735_s27 = smov 128   ;;  %s736_s28 = smov 8  }
  0x1e   : > { %523 = dma.hbm_to_vmem [thread:$0]  (!%p810_p11), %s934_s1, 2048, %s132_s22, [#allocation6], %s735_s27, %s735_s27, %s736_s28  }
  0x1f   : > { %s620_s4 = scalar_lea.vmem %s146_s25, 64  ;;  %p628_p2 = scmp.lt.s32.totalorder %s146_s25, %s146_s25 }
  0x20   : > { %p621_p1 = scmp.ne.s32.totalorder %s146_s25, %s620_s4  ;;  %p629_p6 = scmp.lt.s32.totalorder %s620_s4, %s620_s4 }
  0x22   : > { %p623_p13 = pnand %p621_p1, %p585_p12  ;;  %p630_p5 = por %p629_p6, %p628_p2 }
  0x24   : > { %p624_p0 = pneg %p623_p13 }
  0x26   : > { %p631_p10 = pnand %p630_p5, %p624_p0 }
  0x28   : > { %634 = shalt.err (!%p631_p10)
}
  0x29   : > { %526 = dma.hbm_to_vmem [thread:$0]  (!%p810_p11), %s935_s2, 64, %s146_s25, [#allocation6]  }
  0x2a   : > { %s833_s7 = sadd.s32 1, %s731_s15   ;;  %s27_s8 = sadd.s32 1, %s727_s14 }
  0x2b   : > { %s24_s9 = ssub.s32 %s731_s15, %s833_s7  ;;  %p34_p1 = scmp.ne.s32.totalorder %s727_s14, %s723_s13 }
  0x2c   : > { %p25_p2 = scmp.eq.s32.totalorder %s24_s9, 0  ;;  %p35_p6 = scmp.eq.s32.totalorder %s731_s15, 0 }
  0x2d   : > { %p945_p12 = scmp.eq.s32.totalorder %s782_s16, 1  ;;  %p537_p7 = scmp.lt.s32.totalorder %s731_s15, 2 }
  0x2e   : > { %s849_s11 = scalar_select %p25_p2, %s727_s14, %s27_s8  }
  0x2f   : > { %p843_p3 = por %p945_p12, %p34_p1  ;;  %p36_p9 = por %p35_p6, %p34_p1 }
  0x30   : > { %s156_s17 = sand.u32 1, %s727_s14   ;;  %s443_s22 = sshll.u32 %s731_s15, 7 }
  0x31   : > { %s946_s10 = scalar_select %p843_p3, 1, 0 }
  0x32   : > { %s442_s21 = sshll.u32 %s156_s17, 3  ;;  %s856_s25 = scalar_lea.hbm %s933_s0, %s443_s22 }
  0x33   : > { %s160_s26 = scalar_lea.vmem [#allocation2], %s442_s21  ;;  %p858_p11 = pnand %p537_p7, %p36_p9 }
  0x34   : > { %s167_s27 = sshll.u32 %s160_s26, 4  ;;  %s157_s29 = scalar_lea.sflag [#allocation3], %s156_s17  ;;  %s168_s27 = int_to_ptr.vmem [resolvable:$true] %s167_s27 }
  0x35   : > { %s635_s30 = scalar_lea.hbm %s856_s25, 128  ;;  %p637_p0 = pneg %p858_p11 }
  0x36   : > { %p636_p13 = scmp.ne.s32.totalorder %s856_s25, %s635_s30  ;;  %s640_s6 = scalar_lea.hbm %s933_s0, 256 }
  0x37   : > { %p641_p1 = scmp.lt.s32.totalorder %s856_s25, %s933_s0  ;;  %p642_p2 = scmp.lt.s32.totalorder %s640_s6, %s635_s30 }
  0x38   : > { %p638_p5 = pnand %p637_p0, %p636_p13 }
  0x39   : > { %p643_p6 = por %p642_p2, %p641_p1 }
  0x3a   : > { %p639_p10 = pneg %p638_p5 }
  0x3c   : > { %p644_p12 = pnand %p643_p6, %p639_p10 }
  0x3e   : > { %647 = shalt.err (!%p644_p12)
}
  0x3f   : > { %s648_s21 = scalar_lea.vmem %s168_s27, 128  ;;  %s737_s17 = smov [#allocation2]  }
  0x40   : > { %p649_p7 = scmp.ne.s32.totalorder %s168_s27, %s648_s21  ;;  %s653_s22 = sshll.u32 %s737_s17, 4  ;;  %s654_s22 = int_to_ptr.vmem [resolvable:$false] %s653_s22 }
  0x41   : > { %s655_s23 = scalar_lea.vmem %s654_s22, 256  ;;  %p656_p13 = scmp.lt.s32.totalorder %s168_s27, %s654_s22 }
  0x42   : > { %p651_p9 = pnand %p649_p7, %p637_p0  ;;  %p657_p5 = scmp.lt.s32.totalorder %s655_s23, %s648_s21 }
  0x44   : > { %p652_p3 = pneg %p651_p9  ;;  %p658_p4 = por %p657_p5, %p656_p13 }
  0x46   : > { %p659_p8 = pnand %p658_p4, %p652_p3 }
  0x48   : > { %662 = shalt.err (!%p659_p8)
}
  0x49   : > { %530 = dma.hbm_to_vmem [thread:$0]  (!%p858_p11), %s856_s25, 128, %s168_s27, %s157_s29  }
  0x4a   : > { %p948_p10 = scmp.ne.s32.totalorder %s943_s20, 0 }
  0x4b   : > { %s879_s24 = sand.u32 (!%p948_p10), 1, %s723_s13   ;;  %p949_p4 = scmp.ne.s32.totalorder (!%p948_p10), %s941_s18, 0 }
  0x4c   : > { %176 = sbr.rel (%p948_p10) target bundleno = 652 (0x28c), region = 32  ;;  %s445_s26 = sshll.u32 (!%p948_p10), %s879_s24, 3 }
  0x4d   : > { %s179_s30 = scalar_lea.sflag (!%p948_p10), [#allocation3], %s879_s24  ;;  %s885_s4 = scalar_lea.vmem (!%p948_p10), [#allocation2], %s445_s26 }
  0x51   : > { %706 = dma.done.wait (%p949_p4), %s179_s30, 128  }
  0x52   : > { %708 = vsyncadd (%p949_p4), %s179_s30, 4294967168  ;;  %p950_p8 = scmp.eq.s32.totalorder %s782_s16, 0 }
  0x54   : > { %710 = dma.done.wait (%p950_p8), [#allocation6], 2112   ;;  %p951_p3 = pmov %p950_p8 }
  0x55   : > { %v738_v0 = vmov 0.0   ;;  %vm739_vm0 = vmmov 0   ;;  %v229_v1 = vld [vmem:[#allocation5 + $0x78] sm:$0xff]  ;;  %v228_v2 = vld [vmem:[#allocation5 + $0x70] sm:$0xff]  ;;  %v227_v3 = vld [vmem:[#allocation5 + $0x68] sm:$0xff]  ;;  %s453_s18 = sshll.u32 %s782_s16, 7 }
  0x56   : > { %712 = vsyncadd (%p951_p3), [#allocation6], 4294965184  ;;  %473 = vmatprep.subr.mxu0 %v738_v0  ;;  %505 = vmatprep.mubr.msk.f32.mxu0 %vm739_vm0, %v738_v0  ;;  %v226_v4 = vld [vmem:[#allocation5 + $0x60] sm:$0xff]  ;;  %v225_v5 = vld [vmem:[#allocation5 + $0x58] sm:$0xff]  ;;  %s212_s20 = scalar_lea.vmem [#allocation8], %s445_s26  ;;  %s346_s29 = scalar_lea.hbm %s936_s3, %s453_s18 }
  0x57   : > { %474 = vmatpush3.msra.mxu0 %v229_v1  ;;  %v224_v6 = vld [vmem:[#allocation5 + $0x50] sm:$0xff]  ;;  %v223_v7 = vld [vmem:[#allocation5 + $0x48] sm:$0xff]  ;;  %v222_v8 = vld [vmem:[#allocation5 + $0x40] sm:$0xff]  ;;  %s348_s25 = sshll.u32 %s212_s20, 4  ;;  %s335_s5 = scalar_lea.sflag [#allocation4], %s879_s24  ;;  %s349_s25 = int_to_ptr.vmem [resolvable:$true] %s348_s25 }
  0x58   : > { %475 = vmatprep.subr.mxu0 %v738_v0  ;;  %v221_v9 = vld [vmem:[#allocation5 + $0x38] sm:$0xff]  ;;  %v220_v10 = vld [vmem:[#allocation5 + $0x30] sm:$0xff]  ;;  %v219_v11 = vld [vmem:[#allocation5 + $0x28] sm:$0xff]  ;;  %s663_s6 = scalar_lea.vmem %s349_s25, 128  ;;  %p952_p0 = scmp.ne.s32.totalorder %s946_s10, 0 }
  0x59   : > { %476 = vmatpush3.msra.mxu0 %v228_v2  ;;  %v218_v12 = vld [vmem:[#allocation5 + $0x20] sm:$0xff]  ;;  %v217_v13 = vld [vmem:[#allocation5 + $0x18] sm:$0xff]  ;;  %v216_v14 = vld [vmem:[#allocation5 + $0x10] sm:$0xff]  ;;  %p664_p11 = scmp.ne.s32.totalorder %s349_s25, %s663_s6  ;;  %s740_s8 = smov [#allocation8]  }
  0x5a   : > { %477 = vmatprep.subr.mxu0 %v738_v0  ;;  %v215_v15 = vld [vmem:[#allocation5 + $0x8] sm:$0xff]  ;;  %v214_v16 = vld [vmem:[#allocation5] sm:$0xff]  ;;  %v213_v17 = vld [vmem:[%s885_s4] sm:$0xff]  ;;  %s667_s9 = sshll.u32 %s740_s8, 4  ;;  %s668_s9 = int_to_ptr.vmem [resolvable:$false] %s667_s9 }
  0x5b   : > { %478 = vmatpush3.msra.mxu0 %v227_v3  ;;  %v449_v18 = vld [vmem:[#allocation7] ss:$0 sm:$0xff]  ;;  %v450_v35 = vld [vmem:[#allocation7 + $0x1] ss:$0 sm:$0xff]  ;;  %v451_v37 = vld [vmem:[#allocation7 + $0x2] ss:$0 sm:$0xff]  ;;  %p665_p1 = pnand %p664_p11, %p952_p0  ;;  %p670_p6 = scmp.lt.s32.totalorder %s349_s25, %s668_s9 }
  0x5c   : > { %479 = vmatprep.subr.mxu0 %v738_v0  ;;  %s669_s16 = scalar_lea.vmem %s668_s9, 256 }
  0x5d   : > { %480 = vmatpush3.msra.mxu0 %v226_v4  ;;  %p666_p2 = pneg %p665_p1  ;;  %p671_p12 = scmp.lt.s32.totalorder %s669_s16, %s663_s6 }
  0x5e   : > { %481 = vmatprep.subr.mxu0 %v738_v0 }
  0x5f   : > { %482 = vmatpush3.msra.mxu0 %v225_v5  ;;  %p672_p7 = por %p671_p12, %p670_p6 }
  0x60   : > { %483 = vmatprep.subr.mxu0 %v738_v0 }
  0x61   : > { %484 = vmatpush3.msra.mxu0 %v224_v6  ;;  %p673_p9 = pnand %p672_p7, %p666_p2 }
  0x62   : > { %485 = vmatprep.subr.mxu0 %v738_v0 }
  0x63   : > { %486 = vmatpush3.msra.mxu0 %v223_v7 }
  0x64   : > { %487 = vmatprep.subr.mxu0 %v738_v0 }
  0x65   : > { %488 = vmatpush3.msra.mxu0 %v222_v8 }
  0x66   : > { %489 = vmatprep.subr.mxu0 %v738_v0 }
  0x67   : > { %490 = vmatpush3.msra.mxu0 %v221_v9 }
  0x68   : > { %491 = vmatprep.subr.mxu0 %v738_v0 }
  0x69   : > { %492 = vmatpush3.msra.mxu0 %v220_v10 }
  0x6a   : > { %493 = vmatprep.subr.mxu0 %v738_v0 }
  0x6b   : > { %494 = vmatpush3.msra.mxu0 %v219_v11 }
  0x6c   : > { %495 = vmatprep.subr.mxu0 %v738_v0 }
  0x6d   : > { %496 = vmatpush3.msra.mxu0 %v218_v12 }
  0x6e   : > { %497 = vmatprep.subr.mxu0 %v738_v0 }
  0x6f   : > { %498 = vmatpush3.msra.mxu0 %v217_v13 }
  0x70   : > { %499 = vmatprep.subr.mxu0 %v738_v0 }
  0x71   : > { %500 = vmatpush3.msra.mxu0 %v216_v14 }
  0x72   : > { %501 = vmatprep.subr.mxu0 %v738_v0 }
  0x73   : > { %502 = vmatpush3.msra.mxu0 %v215_v15 }
  0x74   : > { %503 = vmatprep.subr.mxu0 %v738_v0 }
  0x75   : > { %504 = vmatpush3.msra.mxu0 %v214_v16 }
  0x76   : > { %506 = vmatmul.mubr.f32.vlgmr.msra.gmra.mxu0 %v213_v17 }
 0x136   : > { %v301_v19 = vpop.f32.mrf.mxu0 }
 0x137   : > { %v302_v20 = vadd.f32 %v449_v18, %v301_v19 }
 0x138   : > { %v507_v21 = vpop.f32.mrf.mxu0 }
 0x139   : > { %v306_v22 = vmul.f32 0.70710677, %v302_v20  ;;  %v305_v24 = vmul.f32 0.5, %v302_v20 }
 0x13b   : > { %579 = verf.f32 %v306_v22 }
 0x148   : > { %v580_v23 = vpop.eup %579 }
 0x149   : > { %v308_v25 = vadd.f32 1.0, %v580_v23 }
 0x14b   : > { %v309_v26 = vmul.f32 %v308_v25, %v305_v24 }
 0x14d   : > { %310 = vadd.xlane.f32.xlu0 %v309_v26 }
 0x1d6   : > { %v311_v27 = vpop.xlane.xlu0 %310 }
 0x1d7   : > { %v312_v28 = vmul.f32 0.0078125, %v311_v27 }
 0x1d9   : > { %v313_v29 = vsub.f32 %v309_v26, %v312_v28 }
 0x1db   : > { %v314_v30 = vmul.f32 %v313_v29, %v313_v29 }
 0x1dd   : > { %315 = vadd.xlane.f32.xlu0 %v314_v30 }
 0x266   : > { %v316_v31 = vpop.xlane.xlu0 %315 }
 0x267   : > { %v317_v32 = vmul.f32 0.0078125, %v316_v31 }
 0x269   : > { %v318_v33 = vadd.f32 1e-12, %v317_v32 }
 0x26b   : > { %581 = vrsqrt.f32 %v318_v33 }
 0x278   : > { %v582_v34 = vpop.eup %581 }
 0x279   : > { %v320_v36 = vmul.f32 %v582_v34, %v313_v29 }
 0x27b   : > { %v326_v38 = vmul.f32 %v450_v35, %v320_v36 }
 0x27d   : > { %v332_v39 = vadd.f32 %v451_v37, %v326_v38 }
 0x27f   : > { %333 = vst [vmem:[%s212_s20] sm:$0xff] %v332_v39 }
 0x280   : > { %676 = shalt.err (!%p673_p9)
}
 0x281   : > { %s677_s21 = scalar_lea.hbm %s346_s29, 128  ;;  %s681_s23 = scalar_lea.hbm %s936_s3, 256 }
 0x282   : > { %p678_p13 = scmp.ne.s32.totalorder %s346_s29, %s677_s21  ;;  %p682_p4 = scmp.lt.s32.totalorder %s346_s29, %s936_s3 }
 0x283   : > { %p683_p8 = scmp.lt.s32.totalorder %s681_s23, %s677_s21 }
 0x284   : > { %p679_p5 = pnand %p678_p13, %p952_p0 }
 0x285   : > { %p684_p3 = por %p683_p8, %p682_p4 }
 0x286   : > { %p680_p10 = pneg %p679_p5 }
 0x288   : > { %p685_p11 = pnand %p684_p3, %p680_p10 }
 0x28a   : > { %688 = shalt.err (!%p685_p11)
}
 0x28b   : > { %518 = dma.vmem_to_hbm [thread:$0]  (%p952_p0), %s349_s25, 128, %s346_s29, %s335_s5  }
 0x28c PF: > { %s360_s30 = sand.u32 1, %s719_s12   ;;  %p953_p1 = scmp.ne.s32.totalorder %s942_s19, 0 }
 0x28d   : > { %p954_p2 = scmp.ge.s32.totalorder %s731_s15, 2  ;;  %s361_s4 = scalar_lea.sflag [#allocation4], %s360_s30 }
 0x28f   : > { %p532_p6 = pnand %p954_p2, %p953_p1 }
 0x291   : > { %p533_p12 = pneg %p532_p6 }
 0x293   : > { %714 = dma.done.wait (%p533_p12), %s361_s4, 128  }
 0x294   : > { %716 = vsyncadd (%p533_p12), %s361_s4, 4294967168  ;;  %p17_p7 = scmp.ge.s32.totalorder %s833_s7, 4   ;;  %s955_s12 = smov %s723_s13 }
 0x295   : > { %s956_s13 = smov %s727_s14  ;;  %s957_s14 = smov %s849_s11 }
 0x296   : > { %s958_s15 = smov %s833_s7  ;;  %19 = sbr.rel (!%p17_p7) target bundleno = 6 (0x6), region = 85 }
 0x29b   :  { %366 = vsyncpa [#allocation3], 1 }
 0x29c   :  { %368 = vsyncpa [#allocation3 + $0x1], 1 }
 0x29d   :  { %369 = vsyncpa [#allocation6], 1 }
 0x29e   :  { %370 = vsyncpa [#allocation4], 1 }
 0x29f   :  { %372 = vsyncpa [#allocation4 + $0x1], 1 }

</bundles_post_ra>
